<compile_context>
chip_gen: v6e
topology: v6e:2x2x1
jax: 0.10.0
libtpu: 0.0.40
codegen_flags: <defaults>
</compile_context>

<pallas_src>
import functools

import jax
import jax.numpy as jnp
from jax.experimental import pallas as pl
from jax.experimental.pallas import tpu as pltpu

LANE = 128     # lane width: pad all feature dims to this
SUBLANE = 8    # sublane width: pad batch to a multiple of this


def _round_up(n, m):
    return ((n + m - 1) // m) * m


def _triplet_mlp_kernel(x_ref, w1_ref, b1_ref, w2_ref, b2_ref, o_ref):
    """One grid step = one member of the triplet.

    x_ref : (Bp, Dp)  bf16   (Dp lane-padded to 128)
    w1_ref: (Dp, Hp)  bf16   (resident across the grid)
    b1_ref: (1,  Hp)  f32
    w2_ref: (Hp, Ep)  bf16   (resident across the grid)
    b2_ref: (1,  Ep)  f32
    o_ref : (Bp, Ep)  f32    (lane-dense -> unmasked stores)
    """
    # hidden = relu(x @ W1 + b1)  -- bf16 MXU matmul, f32 accumulation
    h = jnp.dot(x_ref[...], w1_ref[...], preferred_element_type=jnp.float32)
    h = jnp.maximum(h + b1_ref[...], 0.0)          # bias add + ReLU in f32 (VPU)
    # out = hidden @ W2 + b2
    o = jnp.dot(h.astype(w2_ref.dtype), w2_ref[...],
                preferred_element_type=jnp.float32)
    o_ref[...] = (o + b2_ref[...]).astype(o_ref.dtype)


def _embed_stack(x_stack, params):
    """Run the embedding MLP on a stacked slab (T, Bp, Dp) in ONE pallas_call."""
    w1, b1, w2, b2 = params
    T, Bp, Dp = x_stack.shape
    Hp = w1.shape[1]
    Ep = w2.shape[1]

    flops = 2 * T * Bp * (Dp * Hp + Hp * Ep)
    bytes_accessed = (x_stack.size * x_stack.dtype.itemsize
                      + w1.size * w1.dtype.itemsize
                      + b1.size * b1.dtype.itemsize
                      + w2.size * w2.dtype.itemsize
                      + b2.size * b2.dtype.itemsize
                      + T * Bp * Ep * 4)
    cost = pl.CostEstimate(flops=flops, transcendentals=0,
                           bytes_accessed=bytes_accessed)

    return pl.pallas_call(
        _triplet_mlp_kernel,
        out_shape=jax.ShapeDtypeStruct((T, Bp, Ep), jnp.float32),
        grid=(T,),
        in_specs=[
            # per-triplet activation slab
            pl.BlockSpec((None, Bp, Dp), lambda t: (t, 0, 0)),
            # weights/biases: constant block index -> DMA'd once, VMEM-resident
            pl.BlockSpec((Dp, Hp), lambda t: (0, 0)),
            pl.BlockSpec((1, Hp), lambda t: (0, 0)),
            pl.BlockSpec((Hp, Ep), lambda t: (0, 0)),
            pl.BlockSpec((1, Ep), lambda t: (0, 0)),
        ],
        out_specs=pl.BlockSpec((None, Bp, Ep), lambda t: (t, 0, 0)),
        compiler_params=pltpu.CompilerParams(
            dimension_semantics=("parallel",)),   # both TCs on v7x
        cost_estimate=cost,
    )(x_stack, w1, b1, w2, b2)


def _pad_and_cast_inputs(xs, d_in, d_pad, b_pad):
    """Pad (B, d_in) activations to (b_pad, d_pad), cast to bf16, stack -> (T, b_pad, d_pad)."""
    out = []
    for x in xs:
        b = x.shape[0]
        xp = jnp.pad(x, ((0, b_pad - b), (0, d_pad - d_in)))
        out.append(xp.astype(jnp.bfloat16))
    return jnp.stack(out, axis=0)


@functools.partial(jax.jit, static_argnames="dims")
def triplet_net_forward(x1, x2, x3, params, dims):
    """Mirrors TripletNet.forward: embed each input, return the 3-tuple."""
    d_in, _, d_emb = dims
    B = x1.shape[0]
    Bp = _round_up(B, SUBLANE)
    Dp = params[0].shape[0]
    x_stack = _pad_and_cast_inputs((x1, x2, x3), d_in, Dp, Bp)
    out = _embed_stack(x_stack, params)          # (3, Bp, Ep) f32
    out = out[:, :B, :d_emb]                     # strip padding outside kernel
    return out[0], out[1], out[2]


@functools.partial(jax.jit, static_argnames="dims")
def get_embedding(x, params, dims):
    """Mirrors TripletNet.get_embedding (same fused kernel, T=1)."""
    d_in, _, d_emb = dims
    B = x.shape[0]
    Bp = _round_up(B, SUBLANE)
    Dp = params[0].shape[0]
    x_stack = _pad_and_cast_inputs((x,), d_in, Dp, Bp)
    return _embed_stack(x_stack, params)[0, :B, :d_emb]


def init_params(key, d_in, hidden, d_emb):
    """Deterministic synthetic init; returns lane-padded kernel params
    (weights bf16, biases f32, feature dims padded to 128)."""
    k1, k2, k3, k4 = jax.random.split(key, 4)
    w1 = jax.random.uniform(k1, (d_in, hidden), jnp.float32, -1.0, 1.0) / jnp.sqrt(d_in)
    b1 = jax.random.uniform(k2, (1, hidden), jnp.float32, -1.0, 1.0) / jnp.sqrt(d_in)
    w2 = jax.random.uniform(k3, (hidden, d_emb), jnp.float32, -1.0, 1.0) / jnp.sqrt(hidden)
    b2 = jax.random.uniform(k4, (1, d_emb), jnp.float32, -1.0, 1.0) / jnp.sqrt(hidden)

    Dp, Hp, Ep = (_round_up(d, LANE) for d in (d_in, hidden, d_emb))
    w1p = jnp.pad(w1, ((0, Dp - d_in), (0, Hp - hidden))).astype(jnp.bfloat16)
    b1p = jnp.pad(b1, ((0, 0), (0, Hp - hidden)))
    w2p = jnp.pad(w2, ((0, Hp - hidden), (0, Ep - d_emb))).astype(jnp.bfloat16)
    b2p = jnp.pad(b2, ((0, 0), (0, Ep - d_emb)))
    return (w1p, b1p, w2p, b2p)


def _reference_embed(x, params, d_in, d_emb):
    """Pure-JAX reference matching the kernel math (bf16 operands, f32 accum)."""
    w1, b1, w2, b2 = params
    Dp = w1.shape[0]
    xp = jnp.pad(x, ((0, 0), (0, Dp - d_in))).astype(jnp.bfloat16)
    h = jnp.dot(xp, w1, preferred_element_type=jnp.float32) + b1
    h = jnp.maximum(h, 0.0)
    o = jnp.dot(h.astype(jnp.bfloat16), w2, preferred_element_type=jnp.float32) + b2
    return o[:, :d_emb]


if __name__ == "__main__":
    B, D_IN, HIDDEN, D_EMB = 8, 32, 64, 16
    DIMS = (D_IN, HIDDEN, D_EMB)

    key = jax.random.PRNGKey(0)
    kp, kx1, kx2, kx3 = jax.random.split(key, 4)

    params = init_params(kp, D_IN, HIDDEN, D_EMB)
    x1 = jax.random.normal(kx1, (B, D_IN), jnp.float32)
    x2 = jax.random.normal(kx2, (B, D_IN), jnp.float32)
    x3 = jax.random.normal(kx3, (B, D_IN), jnp.float32)

    o1, o2, o3 = jax.block_until_ready(
        triplet_net_forward(x1, x2, x3, params, DIMS))

    # Correctness vs. a pure-JAX reference of the same (bf16-matmul) math.
    r1 = _reference_embed(x1, params, D_IN, D_EMB)
    r2 = _reference_embed(x2, params, D_IN, D_EMB)
    r3 = _reference_embed(x3, params, D_IN, D_EMB)
    assert o1.shape == (B, D_EMB) and o2.shape == (B, D_EMB) and o3.shape == (B, D_EMB)
    assert jnp.allclose(o1, r1, atol=1e-4, rtol=1e-4)
    assert jnp.allclose(o2, r2, atol=1e-4, rtol=1e-4)
    assert jnp.allclose(o3, r3, atol=1e-4, rtol=1e-4)

    # get_embedding path (T=1 grid) also checked.
    e1 = jax.block_until_ready(get_embedding(x1, params, DIMS))
    assert e1.shape == (B, D_EMB)
    assert jnp.allclose(e1, r1, atol=1e-4, rtol=1e-4)

    print("KERNEL_OK")
</pallas_src>

<mosaic_0001>
module attributes {stable_mosaic.version = 11 : i64} {
  func.func @_triplet_mlp_kernel(%arg0: i32, %arg1: memref<1x8x128xbf16, #tpu.memory_space<vmem>>, %arg2: memref<128x128xbf16, #tpu.memory_space<vmem>>, %arg3: memref<1x128xf32, #tpu.memory_space<vmem>>, %arg4: memref<128x128xbf16, #tpu.memory_space<vmem>>, %arg5: memref<1x128xf32, #tpu.memory_space<vmem>>, %arg6: memref<1x8x128xf32, #tpu.memory_space<vmem>>) attributes {dimension_semantics = [#tpu.dimension_semantics<parallel>], iteration_bounds = array<i64: 3>, scalar_prefetch = 0 : i64, scratch_operands = 0 : i64, tpu.core_type = #tpu.core_type<tc>, window_params = [{transform_indices = @transform_0, window_bounds = array<i64: 1, 8, 128>}, {pipeline_mode = #tpu.pipeline_mode<synchronous>, transform_indices = @transform_1, window_bounds = array<i64: 128, 128>}, {pipeline_mode = #tpu.pipeline_mode<synchronous>, transform_indices = @transform_2, window_bounds = array<i64: 1, 128>}, {pipeline_mode = #tpu.pipeline_mode<synchronous>, transform_indices = @transform_3, window_bounds = array<i64: 128, 128>}, {pipeline_mode = #tpu.pipeline_mode<synchronous>, transform_indices = @transform_4, window_bounds = array<i64: 1, 128>}, {transform_indices = @transform_5, window_bounds = array<i64: 1, 8, 128>}]} {
    %c0 = arith.constant 0 : index
    %c0_0 = arith.constant 0 : index
    %c0_1 = arith.constant 0 : index
    %0 = vector.load %arg1[%c0, %c0_0, %c0_1] : memref<1x8x128xbf16, #tpu.memory_space<vmem>>, vector<1x8x128xbf16>
    %1 = vector.shape_cast %0 : vector<1x8x128xbf16> to vector<8x128xbf16>
    %c0_2 = arith.constant 0 : index
    %c0_3 = arith.constant 0 : index
    %2 = vector.load %arg2[%c0_2, %c0_3] : memref<128x128xbf16, #tpu.memory_space<vmem>>, vector<128x128xbf16>
    %cst = arith.constant dense<0.000000e+00> : vector<8x128xf32>
    %3 = tpu.matmul %1, %2, %cst {dimension_numbers = #tpu.dot_dimension_numbers<[1], [0], [0], [1], [0, 0, 1, 1], [], []>} : vector<8x128xbf16>, vector<128x128xbf16>, vector<8x128xf32> -> vector<8x128xf32>
    %c0_4 = arith.constant 0 : index
    %c0_5 = arith.constant 0 : index
    %4 = vector.load %arg3[%c0_4, %c0_5] : memref<1x128xf32, #tpu.memory_space<vmem>>, vector<1x128xf32>
    %5 = vector.broadcast %4 : vector<1x128xf32> to vector<8x128xf32>
    %6 = arith.addf %3, %5 : vector<8x128xf32>
    %cst_6 = arith.constant 0.000000e+00 : f32
    %7 = vector.broadcast %cst_6 : f32 to vector<8x128xf32>
    %8 = arith.maximumf %6, %7 : vector<8x128xf32>
    %9 = arith.truncf %8 : vector<8x128xf32> to vector<8x128xbf16>
    %c0_7 = arith.constant 0 : index
    %c0_8 = arith.constant 0 : index
    %10 = vector.load %arg4[%c0_7, %c0_8] : memref<128x128xbf16, #tpu.memory_space<vmem>>, vector<128x128xbf16>
    %cst_9 = arith.constant dense<0.000000e+00> : vector<8x128xf32>
    %11 = tpu.matmul %9, %10, %cst_9 {dimension_numbers = #tpu.dot_dimension_numbers<[1], [0], [0], [1], [0, 0, 1, 1], [], []>} : vector<8x128xbf16>, vector<128x128xbf16>, vector<8x128xf32> -> vector<8x128xf32>
    %c0_10 = arith.constant 0 : index
    %c0_11 = arith.constant 0 : index
    %12 = vector.load %arg5[%c0_10, %c0_11] : memref<1x128xf32, #tpu.memory_space<vmem>>, vector<1x128xf32>
    %13 = vector.broadcast %12 : vector<1x128xf32> to vector<8x128xf32>
    %14 = arith.addf %11, %13 : vector<8x128xf32>
    %c0_12 = arith.constant 0 : index
    %c0_13 = arith.constant 0 : index
    %c0_14 = arith.constant 0 : index
    %15 = vector.load %arg6[%c0_12, %c0_13, %c0_14] : memref<1x8x128xf32, #tpu.memory_space<vmem>>, vector<1x8x128xf32>
    %16 = vector.shape_cast %15 : vector<1x8x128xf32> to vector<8x128xf32>
    %17 = vector.shape_cast %14 : vector<8x128xf32> to vector<1x8x128xf32>
    tpu.vector_store %arg6[%c0_12, %c0_13, %c0_14], %17 {strides = array<i32>} : memref<1x8x128xf32, #tpu.memory_space<vmem>>, vector<1x8x128xf32>,
    return
  }
  func.func @transform_0(%arg0: i32) -> (i32, i32, i32) {
    %c0_i32 = arith.constant 0 : i32
    %c0_i32_0 = arith.constant 0 : i32
    %c0_i32_1 = arith.constant 0 : i32
    return %arg0, %c0_i32, %c0_i32_0 : i32, i32, i32
  }
  func.func @transform_1(%arg0: i32) -> (i32, i32) {
    %c0_i32 = arith.constant 0 : i32
    %c0_i32_0 = arith.constant 0 : i32
    %c0_i32_1 = arith.constant 0 : i32
    return %c0_i32, %c0_i32_0 : i32, i32
  }
  func.func @transform_2(%arg0: i32) -> (i32, i32) {
    %c0_i32 = arith.constant 0 : i32
    %c0_i32_0 = arith.constant 0 : i32
    %c0_i32_1 = arith.constant 0 : i32
    return %c0_i32, %c0_i32_0 : i32, i32
  }
  func.func @transform_3(%arg0: i32) -> (i32, i32) {
    %c0_i32 = arith.constant 0 : i32
    %c0_i32_0 = arith.constant 0 : i32
    %c0_i32_1 = arith.constant 0 : i32
    return %c0_i32, %c0_i32_0 : i32, i32
  }
  func.func @transform_4(%arg0: i32) -> (i32, i32) {
    %c0_i32 = arith.constant 0 : i32
    %c0_i32_0 = arith.constant 0 : i32
    %c0_i32_1 = arith.constant 0 : i32
    return %c0_i32, %c0_i32_0 : i32, i32
  }
  func.func @transform_5(%arg0: i32) -> (i32, i32, i32) {
    %c0_i32 = arith.constant 0 : i32
    %c0_i32_0 = arith.constant 0 : i32
    %c0_i32_1 = arith.constant 0 : i32
    return %arg0, %c0_i32, %c0_i32_0 : i32, i32, i32
  }
}

</mosaic_0001>

<bundles_post_ra>
// kernel: triplet_net_forward.1
= control target key start
LH: loop header
LB: loop body
LE: loop exit
PB: predicated region body
PF: predicated region fallthrough
CT: control target
= control target key end

     0   :  { %10 = vsyncpa [#allocation3], 0  ;;  %s726_s18 = smov 0   ;;  %s799_s0 = inlined_call_operand.vmem [shape: bf16[3,8,128], index: 0, kind: input, shape index: {}]   ;;  %s800_s1 = inlined_call_operand.vmem [shape: bf16[128,128], index: 1, kind: input, shape index: {}]   ;;  %s801_s2 = inlined_call_operand.vmem [shape: f32[1,128], index: 2, kind: input, shape index: {}]   ;;  %s802_s3 = inlined_call_operand.hbm [shape: bf16[128,128], index: 3, kind: input, shape index: {}]   ;;  %s803_s4 = inlined_call_operand.vmem [shape: f32[1,128], index: 4, kind: input, shape index: {}]   ;;  %s804_s5 = inlined_call_operand.vmem [shape: f32[3,8,128], index: 5, kind: output, shape index: {}]  }
   0x1 LB: > { %s732_s19 = sadd.s32 4294967295, %s689_s18   ;;  %p529_p0 = scmp.ge.s32.totalorder %s689_s18, 1  ;;  %s689_s18 = sphi %s726_s18, %s16_s18  }
   0x2   : > { %p157_p1 = scmp.lt.s32.totalorder %s689_s18, 4  ;;  %s691_s20 = smov [#allocation2]  }
   0x3   : > { %s175_s21 = sshll.u32 %s691_s20, 4  ;;  %p622_p3 = scmp.eq.s32.totalorder %s732_s19, 0  ;;  %s176_s21 = int_to_ptr.vmem [resolvable:$true] %s175_s21 }
   0x4   : > { %p736_p2 = pnand %p529_p0, %p157_p1  ;;  %s664_s23 = scalar_lea.vmem %s176_s21, 1024 }
   0x5   : > { %p665_p7 = scmp.ne.s32.totalorder %s176_s21, %s664_s23  ;;  %p672_p10 = scmp.lt.s32.totalorder %s176_s21, %s176_s21 }
   0x6   : > { %p618_p4 = pneg %p736_p2  ;;  %p673_p11 = scmp.lt.s32.totalorder %s664_s23, %s664_s23 }
   0x8   : > { %p619_p5 = pnand %p622_p3, %p618_p4  ;;  %p674_p12 = por %p673_p11, %p672_p10 }
   0xa   : > { %p655_p6 = pneg %p619_p5 }
   0xc   : > { %p667_p8 = pnand %p665_p7, %p655_p6 }
   0xe   : > { %p668_p9 = pneg %p667_p8 }
  0x10   : > { %p675_p13 = pnand %p674_p12, %p668_p9 }
  0x12   : > { %678 = shalt.err (!%p675_p13)
}
  0x13   : > { %s692_s24 = smov 64   ;;  %s693_s25 = smov 4  }
  0x14   : > { %621 = dma.hbm_to_vmem [thread:$0]  (!%p619_p5), %s802_s3, 1024, %s176_s21, [#allocation3], %s692_s24, %s692_s24, %s693_s25  }
  0x15   : > { %201 = sbr.rel (%p736_p2) target bundleno = 459 (0x1cb), region = 40 }
  0x1a   : > { %684 = dma.done.wait (%p622_p3), [#allocation3], 1024  }
  0x1b   : > { %686 = vsyncadd (%p622_p3), [#allocation3], 4294966272  ;;  %v694_v0 = vmov 0.0   ;;  %vm695_vm0 = vmmov 0   ;;  %v637_v1 = vld [vmem:[%s800_s1 + $0x38] sm:$0xff]   ;;  %v638_v2 = vld [vmem:[%s800_s1 + $0x30] sm:$0xff]  }
  0x1c   : > { %574 = vmatprep.subr.bf16.mxu0 %v694_v0  ;;  %590 = vmatprep.mubr.msk.bf16.mxu0 %vm695_vm0, %v694_v0  ;;  %v639_v3 = vld [vmem:[%s800_s1 + $0x28] sm:$0xff]   ;;  %v645_v4 = vld [vmem:[#allocation2 + $0x38] sm:$0xff]   ;;  %v640_v5 = vld [vmem:[%s800_s1 + $0x20] sm:$0xff]   ;;  %p227_p0 = scmp.lt.s32.totalorder %s732_s19, 2 }
  0x1d   : > { %594 = vmatprep.subr.bf16.mxu1 %v694_v0  ;;  %610 = vmatprep.mubr.msk.bf16.mxu1 %vm695_vm0, %v694_v0  ;;  %v646_v6 = vld [vmem:[#allocation2 + $0x30] sm:$0xff]   ;;  %v641_v7 = vld [vmem:[%s800_s1 + $0x18] sm:$0xff]   ;;  %v647_v8 = vld [vmem:[#allocation2 + $0x28] sm:$0xff]  }
  0x1e   : > { %575 = vmatpush3.bf16.msra.mxu0 %v637_v1  ;;  %595 = vmatpush3.bf16.msra.mxu1 %v645_v4  ;;  %v642_v9 = vld [vmem:[%s800_s1 + $0x10] sm:$0xff]   ;;  %v648_v10 = vld [vmem:[#allocation2 + $0x20] sm:$0xff]   ;;  %s807_s19 = smov (!%p227_p0, %s732_s19), 2  ;;  %v643_v11 = vld [vmem:[%s800_s1 + $0x8] sm:$0xff]  }
  0x1f   : > { %576 = vmatprep.subr.bf16.mxu0 %v694_v0  ;;  %596 = vmatprep.subr.bf16.mxu1 %v694_v0  ;;  %v649_v12 = vld [vmem:[#allocation2 + $0x18] sm:$0xff]   ;;  %s534_s17 = sshll.u32 %s807_s19, 2  ;;  %v644_v13 = vld [vmem:[%s800_s1] sm:$0xff]   ;;  %v650_v14 = vld [vmem:[#allocation2 + $0x10] sm:$0xff]   ;;  %s535_s27 = sshll.u32 %s807_s19, 3 }
  0x20   : > { %s230_s24 = scalar_lea.vmem %s799_s0, %s534_s17  ;;  %v651_v16 = vld [vmem:[#allocation2 + $0x8] sm:$0xff]   ;;  %v652_v17 = vld [vmem:[#allocation2] sm:$0xff]   ;;  %s234_s7 = scalar_lea.vmem %s804_s5, %s535_s27 }
  0x21   : > { %v236_v15 = vld [vmem:[%s230_s24] sm:$0xf] }
  0x22   : > { %577 = vmatpush3.bf16.msra.mxu0 %v638_v2  ;;  %597 = vmatpush3.bf16.msra.mxu1 %v646_v6  ;;  %v536_v18 = vld [vmem:[%s801_s2] ss:$0 sm:$0xff] }
  0x23   : > { %578 = vmatprep.subr.bf16.mxu0 %v694_v0  ;;  %598 = vmatprep.subr.bf16.mxu1 %v694_v0  ;;  %v545_v26 = vld [vmem:[%s803_s4] ss:$0 sm:$0xff] }
  0x26   : > { %579 = vmatpush3.bf16.msra.mxu0 %v639_v3  ;;  %599 = vmatpush3.bf16.msra.mxu1 %v647_v8 }
  0x27   : > { %580 = vmatprep.subr.bf16.mxu0 %v694_v0  ;;  %600 = vmatprep.subr.bf16.mxu1 %v694_v0 }
  0x2a   : > { %581 = vmatpush3.bf16.msra.mxu0 %v640_v5  ;;  %601 = vmatpush3.bf16.msra.mxu1 %v648_v10 }
  0x2b   : > { %582 = vmatprep.subr.bf16.mxu0 %v694_v0  ;;  %602 = vmatprep.subr.bf16.mxu1 %v694_v0 }
  0x2e   : > { %583 = vmatpush3.bf16.msra.mxu0 %v641_v7  ;;  %603 = vmatpush3.bf16.msra.mxu1 %v649_v12 }
  0x2f   : > { %584 = vmatprep.subr.bf16.mxu0 %v694_v0  ;;  %604 = vmatprep.subr.bf16.mxu1 %v694_v0 }
  0x32   : > { %585 = vmatpush3.bf16.msra.mxu0 %v642_v9  ;;  %605 = vmatpush3.bf16.msra.mxu1 %v650_v14 }
  0x33   : > { %586 = vmatprep.subr.bf16.mxu0 %v694_v0  ;;  %606 = vmatprep.subr.bf16.mxu1 %v694_v0 }
  0x36   : > { %587 = vmatpush3.bf16.msra.mxu0 %v643_v11  ;;  %607 = vmatpush3.bf16.msra.mxu1 %v651_v16 }
  0x37   : > { %588 = vmatprep.subr.bf16.mxu0 %v694_v0  ;;  %608 = vmatprep.subr.bf16.mxu1 %v694_v0 }
  0x3a   : > { %589 = vmatpush3.bf16.msra.mxu0 %v644_v13  ;;  %609 = vmatpush3.bf16.msra.mxu1 %v652_v17 }
  0x3d   : > { %591 = vmatmul.mubr.bf16.vlgmr.msra.gmra.mxu0 %v236_v15 }
  0xfd   : > { %v342_v19 = vpop.f32.mrf.mxu0 }
  0xfe   : > { %v343_v20 = vadd.f32 %v536_v18, %v342_v19 }
  0xff   : > { %v592_v21 = vpop.f32.mrf.mxu0 }
 0x100   : > { %v348_v22 = vmax.f32 %v343_v20, 0.0 }
 0x101   : > { %v345_v23 = vpop.f32.mrf.mxu0 }
 0x102   : > { %v349_v24 = vpack.c.bf16 %v348_v22, %v348_v22 }
 0x103   : > { %v593_v25 = vpop.f32.mrf.mxu0 }
 0x104   : > { %611 = vmatmul.mubr.bf16.vlgmr.msra.gmra.mxu1 %v349_v24 }
 0x1c4   : > { %v455_v27 = vpop.f32.mrf.mxu1 }
 0x1c5   : > { %v456_v28 = vadd.f32 %v545_v26, %v455_v27 }
 0x1c6   : > { %v612_v29 = vpop.f32.mrf.mxu1 }
 0x1c7   : > { %461 = vst [vmem:[%s234_s7] sm:$0xff] %v456_v28 }
 0x1c8   : > { %v458_v30 = vpop.f32.mrf.mxu1 }
 0x1ca   : > { %v613_v31 = vpop.f32.mrf.mxu1 }
 0x1cb PF: > { %s16_s18 = sadd.s32 1, %s689_s18  }
 0x1cc   : > { %p13_p1 = scmp.ge.s32.totalorder %s16_s18, 5  }
 0x1ce   :  { %15 = sbr.rel (!%p13_p1) target bundleno = 1 (0x1), region = 75 }
 0x1d3   :  { %481 = vsyncpa [#allocation3], 1 }
 0x1d4   :  { %483 = vsyncpa [#allocation3 + $0x1], 1 }

</bundles_post_ra>
